<compile_context>
chip_gen: v5e
topology: v5e:2x2
jax: 0.10.0
libtpu: 0.0.40
codegen_flags: <defaults>
</compile_context>

<pallas_src>
import functools

import jax
import jax.numpy as jnp
from jax.experimental import pallas as pl
from jax.experimental.pallas import tpu as pltpu


def _pick_tile(n, cap, step=8):
    """Largest multiple-of-`step` divisor of n that is <= cap (or n itself)."""
    if n <= cap:
        return n
    t = (cap // step) * step
    while t >= step:
        if n % t == 0:
            return t
        t -= step
    return n


# ----------------------------------------------------------------------------
# Kernel 1: preprocess  (x - mean[c]) * (1/std[c])  +  fused pooled stand-in
# ----------------------------------------------------------------------------
def _preprocess_pool_kernel(x_ref, mean_ref, inv_std_ref, ph_ref, pw_ref,
                            xout_ref, pool_ref, *, pool_scale):
    # x_ref: (1, C, th, W) f32 block; mean/inv_std: (C,) scalars in SMEM.
    C = x_ref.shape[1]
    acc = None
    for c in range(C):                                   # static unroll (C small)
        xc = (x_ref[0, c] - mean_ref[c]) * inv_std_ref[c]   # (th, W) f32
        xout_ref[0, c] = xc.astype(xout_ref.dtype)           # bf16 writeback
        acc = xc if acc is None else acc + xc

    # Stand-in decoder logits: 2.0 * mean over (C, pool, pool) windows,
    # expressed as two small MXU matmuls (no reshape / relayout needed).
    hp = jnp.dot(ph_ref[...], acc, preferred_element_type=jnp.float32)      # (th/p, W)
    pool_ref[0] = jnp.dot(hp, pw_ref[...],
                          preferred_element_type=jnp.float32) * pool_scale  # (th/p, W/p)


def preprocess_and_pool(x, pixel_mean, pixel_std, pool=4, tile_h_cap=512):
    """Returns (normalized image in bf16, pooled stand-in mask logits)."""
    B, C, H, W = x.shape
    assert H % pool == 0 and W % pool == 0, "stand-in pool requires divisibility"
    th = _pick_tile(H, tile_h_cap, step=8 * pool)   # th % (8*pool) == 0 unless th == H
    assert H % th == 0 and th % pool == 0
    n_h = H // th
    hm, wm = H // pool, W // pool

    mean = pixel_mean.astype(jnp.float32)
    inv_std = (1.0 / pixel_std).astype(jnp.float32)

    # Window-sum matrices for the stand-in pooling (rows/cols pick 4-wide groups).
    ph = (jnp.arange(th)[None, :] // pool ==
          jnp.arange(th // pool)[:, None]).astype(jnp.float32)   # (th/p, th)
    pw = (jnp.arange(W)[:, None] // pool ==
          jnp.arange(wm)[None, :]).astype(jnp.float32)           # (W, W/p)
    pool_scale = 2.0 / float(C * pool * pool)

    kern = functools.partial(_preprocess_pool_kernel, pool_scale=pool_scale)
    x_pre, mask_logits = pl.pallas_call(
        kern,
        out_shape=(jax.ShapeDtypeStruct((B, C, H, W), jnp.bfloat16),
                   jax.ShapeDtypeStruct((B, hm, wm), jnp.float32)),
        grid=(B, n_h),
        in_specs=[
            pl.BlockSpec((1, C, th, W), lambda b, h: (b, 0, h, 0)),
            pl.BlockSpec(memory_space=pltpu.MemorySpace.SMEM),
            pl.BlockSpec(memory_space=pltpu.MemorySpace.SMEM),
            pl.BlockSpec((th // pool, th), lambda b, h: (0, 0)),
            pl.BlockSpec((W, wm), lambda b, h: (0, 0)),
        ],
        out_specs=(pl.BlockSpec((1, C, th, W), lambda b, h: (b, 0, h, 0)),
                   pl.BlockSpec((1, th // pool, wm), lambda b, h: (b, h, 0))),
        compiler_params=pltpu.CompilerParams(
            dimension_semantics=("parallel", "parallel"),
            vmem_limit_bytes=48 * 1024 * 1024),
    )(x, mean, inv_std, ph, pw)
    return x_pre, mask_logits


# ----------------------------------------------------------------------------
# Bilinear interpolation matrices (PyTorch align_corners=False semantics)
# ----------------------------------------------------------------------------
def _bilinear_matrix(out_size, in_size):
    i = jnp.arange(out_size, dtype=jnp.float32)
    src = (i + 0.5) * (in_size / out_size) - 0.5
    src = jnp.maximum(src, 0.0)                       # PyTorch clamps at 0
    i0 = jnp.minimum(jnp.floor(src).astype(jnp.int32), in_size - 1)
    i1 = jnp.minimum(i0 + 1, in_size - 1)
    w1 = src - i0.astype(jnp.float32)
    w0 = 1.0 - w1
    oh0 = jax.nn.one_hot(i0, in_size, dtype=jnp.float32)
    oh1 = jax.nn.one_hot(i1, in_size, dtype=jnp.float32)
    return w0[:, None] * oh0 + w1[:, None] * oh1      # (out_size, in_size)


# ----------------------------------------------------------------------------
# Kernel 2 (fused): bilinear upsample tile + sigmoid-CE + dice accumulation
# ----------------------------------------------------------------------------
def _fused_upsample_loss_kernel(lh_ref, mask_ref, lwt_ref, tgt_ref,
                                ce_out, num_out, den_out,
                                ce_acc, num_acc, den_acc):
    h = pl.program_id(2)

    @pl.when(h == 0)
    def _():
        ce_acc[...] = jnp.zeros_like(ce_acc)
        num_acc[...] = jnp.zeros_like(num_acc)
        den_acc[...] = jnp.zeros_like(den_acc)

    # --- bilinear upsample of this row-tile on the MXU ----------------------
    # bf16 operands (mask already bf16 from the wrapper), f32 accumulation.
    m = mask_ref[0]                                                 # (hm, wm) bf16
    tmp = jnp.dot(lh_ref[...], m, preferred_element_type=jnp.float32)   # (tile_h, wm)
    x = jnp.dot(tmp.astype(jnp.bfloat16), lwt_ref[...],
                preferred_element_type=jnp.float32)                 # (tile_h, W)
    t = tgt_ref[0].astype(jnp.float32)                              # (tile_h, W)

    # --- numerically stable BCE-with-logits, one exp / element --------------
    e = jnp.exp(-jnp.abs(x))
    ce = jnp.maximum(x, 0.0) - x * t + jnp.log1p(e)
    ce_acc[...] += jnp.sum(ce, axis=0, keepdims=True)               # (1, W) partial

    # --- sigmoid from e via one approx reciprocal (EUP slot) ----------------
    r = pl.reciprocal(1.0 + e, approx=True)
    s = jnp.where(x >= 0.0, r, e * r)
    num_acc[...] += jnp.sum(s * t, axis=0, keepdims=True)
    den_acc[...] += jnp.sum(s + t, axis=0, keepdims=True)

    # --- finalize this split: lane reduction to raw partial sums ------------
    @pl.when(h == pl.num_programs(2) - 1)
    def _():
        ce_out[...] = jnp.sum(ce_acc[...], keepdims=True)
        num_out[...] = jnp.sum(num_acc[...], keepdims=True)
        den_out[...] = jnp.sum(den_acc[...], keepdims=True)


def fused_upsample_losses(mask_small, gt_mask, img_size, *,
                          scale=1000.0, eps=1e-6, tile_h_cap=512):
    """mask_small: (B, hm, wm) decoder logits; gt_mask: (B, H, W) binary."""
    B, hm, wm = mask_small.shape
    H = W = img_size

    lh = _bilinear_matrix(H, hm).astype(jnp.bfloat16)      # (H, hm)
    lwt = _bilinear_matrix(W, wm).T.astype(jnp.bfloat16)   # (wm, W)
    gt = gt_mask.astype(jnp.bfloat16)                      # binary -> exact bf16
    mask_bf16 = mask_small.astype(jnp.bfloat16)            # cast ONCE, not per step

    tile_h = _pick_tile(H, tile_h_cap)
    assert H % tile_h == 0
    n_h = H // tile_h
    # Second parallel axis over H halves so v7x megacore is busy at small B.
    num_splits = 2 if n_h % 2 == 0 else 1
    n_inner = n_h // num_splits

    ce_p, num_p, den_p = pl.pallas_call(
        _fused_upsample_loss_kernel,
        out_shape=(jax.ShapeDtypeStruct((B, num_splits), jnp.float32),
                   jax.ShapeDtypeStruct((B, num_splits), jnp.float32),
                   jax.ShapeDtypeStruct((B, num_splits), jnp.float32)),
        grid=(B, num_splits, n_inner),
        in_specs=[
            pl.BlockSpec((tile_h, hm), lambda b, s, h: (s * n_inner + h, 0)),   # Lh tile
            pl.BlockSpec((1, hm, wm), lambda b, s, h: (b, 0, 0)),               # small mask
            pl.BlockSpec((wm, W), lambda b, s, h: (0, 0)),                      # LwT resident
            pl.BlockSpec((1, tile_h, W), lambda b, s, h: (b, s * n_inner + h, 0)),  # gt tile
        ],
        out_specs=(pl.BlockSpec((1, 1), lambda b, s, h: (b, s)),
                   pl.BlockSpec((1, 1), lambda b, s, h: (b, s)),
                   pl.BlockSpec((1, 1), lambda b, s, h: (b, s))),
        scratch_shapes=[pltpu.VMEM((1, W), jnp.float32),
                        pltpu.VMEM((1, W), jnp.float32),
                        pltpu.VMEM((1, W), jnp.float32)],
        compiler_params=pltpu.CompilerParams(
            dimension_semantics=("parallel", "parallel", "arbitrary"),
            vmem_limit_bytes=32 * 1024 * 1024),
    )(lh, mask_bf16, lwt, gt)

    # Tiny finalize in XLA, matching the reference formulas exactly:
    #   ce   = mean over H*W of BCE-with-logits
    #   dice = 1 - (2*sum(s*t)/scale + eps) / ((sum(s) + sum(t))/scale + eps)
    ce = jnp.sum(ce_p, axis=1) / float(H * W)
    num = jnp.sum(num_p, axis=1) / scale
    den = jnp.sum(den_p, axis=1) / scale
    dice = 1.0 - (2.0 * num + eps) / (den + eps)
    return ce, dice


# ----------------------------------------------------------------------------
# IVM.forward (loss path)
# ----------------------------------------------------------------------------
def ivm_forward(images, gt_mask, pixel_mean, pixel_std, img_size):
    # Kernel 1: preprocess (normalize, bf16 output) fused with the pooled
    # stand-in decoder logits, so the full-resolution tensor is not re-read.
    # TODO(synk): x_pre would feed ImageEncoderViT -> LLaVAEncoder ->
    # ConditionedMaskDecoder (checkpoint-loaded, not defined in the reference).
    x_pre, mask_logits = preprocess_and_pool(images, pixel_mean, pixel_std)
    del x_pre  # consumed by the (absent) real image encoder

    # Kernel 2: fused postprocess_masks + sigmoid_ce_loss + dice_loss — the
    # upsampled (B, img_size, img_size) f32 mask never touches HBM.
    ce, dice = fused_upsample_losses(mask_logits, gt_mask, img_size)

    loss = jnp.mean(ce + dice)
    return {
        "loss": loss,
        "generator_ce_loss": jnp.mean(ce),
        "generator_dice_loss": jnp.mean(dice),
    }


if __name__ == "__main__":
    B, C = 2, 3
    IMG = 64          # stands in for img_size=1024 in the real model

    key = jax.random.PRNGKey(0)
    k_img, k_msk = jax.random.split(key)
    images = jax.random.uniform(k_img, (B, C, IMG, IMG), dtype=jnp.float32)
    gt_mask = (jax.random.uniform(k_msk, (B, IMG, IMG)) > 0.5).astype(jnp.float32)

    pixel_mean = jnp.array([0.485, 0.456, 0.406], dtype=jnp.float32)
    pixel_std = jnp.array([0.229, 0.224, 0.225], dtype=jnp.float32)

    out = ivm_forward(images, gt_mask, pixel_mean, pixel_std, IMG)
    jax.block_until_ready(out["loss"])
    assert out["loss"].shape == ()
    print("KERNEL_OK")
</pallas_src>

<mosaic_0001>
module attributes {stable_mosaic.version = 11 : i64} {
  func.func @_preprocess_pool_kernel(%arg0: i32, %arg1: i32, %arg2: memref<1x3x64x64xf32, #tpu.memory_space<vmem>>, %arg3: memref<3xf32, #tpu.memory_space<smem>>, %arg4: memref<3xf32, #tpu.memory_space<smem>>, %arg5: memref<16x64xf32, #tpu.memory_space<vmem>>, %arg6: memref<64x16xf32, #tpu.memory_space<vmem>>, %arg7: memref<1x3x64x64xbf16, #tpu.memory_space<vmem>>, %arg8: memref<1x16x16xf32, #tpu.memory_space<vmem>>) attributes {dimension_semantics = [#tpu.dimension_semantics<parallel>, #tpu.dimension_semantics<parallel>], iteration_bounds = array<i64: 2, 1>, scalar_prefetch = 0 : i64, scratch_operands = 0 : i64, tpu.core_type = #tpu.core_type<tc>, window_params = [{transform_indices = @transform_0, window_bounds = array<i64: 1, 3, 64, 64>}, {transform_indices = @transform_1, window_bounds = array<i64: 3>}, {transform_indices = @transform_2, window_bounds = array<i64: 3>}, {pipeline_mode = #tpu.pipeline_mode<synchronous>, transform_indices = @transform_3, window_bounds = array<i64: 16, 64>}, {pipeline_mode = #tpu.pipeline_mode<synchronous>, transform_indices = @transform_4, window_bounds = array<i64: 64, 16>}, {transform_indices = @transform_5, window_bounds = array<i64: 1, 3, 64, 64>}, {transform_indices = @transform_6, window_bounds = array<i64: 1, 16, 16>}]} {
    %c0 = arith.constant 0 : index
    %c0_0 = arith.constant 0 : index
    %c0_1 = arith.constant 0 : index
    %c0_2 = arith.constant 0 : index
    %0 = vector.load %arg2[%c0, %c0_0, %c0_1, %c0_2] : memref<1x3x64x64xf32, #tpu.memory_space<vmem>>, vector<1x1x64x64xf32>
    %1 = vector.shape_cast %0 : vector<1x1x64x64xf32> to vector<64x64xf32>
    %c0_3 = arith.constant 0 : index
    %2 = memref.load %arg3[%c0_3] : memref<3xf32, #tpu.memory_space<smem>>
    %3 = vector.broadcast %2 : f32 to vector<64x64xf32>
    %4 = arith.subf %1, %3 : vector<64x64xf32>
    %c0_4 = arith.constant 0 : index
    %5 = memref.load %arg4[%c0_4] : memref<3xf32, #tpu.memory_space<smem>>
    %6 = vector.broadcast %5 : f32 to vector<64x64xf32>
    %7 = arith.mulf %4, %6 : vector<64x64xf32>
    %8 = arith.truncf %7 : vector<64x64xf32> to vector<64x64xbf16>
    %c0_5 = arith.constant 0 : index
    %c0_6 = arith.constant 0 : index
    %c0_7 = arith.constant 0 : index
    %c0_8 = arith.constant 0 : index
    %9 = vector.load %arg7[%c0_5, %c0_6, %c0_7, %c0_8] : memref<1x3x64x64xbf16, #tpu.memory_space<vmem>>, vector<1x1x64x64xbf16>
    %10 = vector.shape_cast %9 : vector<1x1x64x64xbf16> to vector<64x64xbf16>
    %11 = vector.shape_cast %8 : vector<64x64xbf16> to vector<1x1x64x64xbf16>
    tpu.vector_store %arg7[%c0_5, %c0_6, %c0_7, %c0_8], %11 {strides = array<i32>} : memref<1x3x64x64xbf16, #tpu.memory_space<vmem>>, vector<1x1x64x64xbf16>,
    %c0_9 = arith.constant 0 : index
    %c1 = arith.constant 1 : index
    %c0_10 = arith.constant 0 : index
    %c0_11 = arith.constant 0 : index
    %12 = vector.load %arg2[%c0_9, %c1, %c0_10, %c0_11] : memref<1x3x64x64xf32, #tpu.memory_space<vmem>>, vector<1x1x64x64xf32>
    %13 = vector.shape_cast %12 : vector<1x1x64x64xf32> to vector<64x64xf32>
    %c1_12 = arith.constant 1 : index
    %14 = memref.load %arg3[%c1_12] : memref<3xf32, #tpu.memory_space<smem>>
    %15 = vector.broadcast %14 : f32 to vector<64x64xf32>
    %16 = arith.subf %13, %15 : vector<64x64xf32>
    %c1_13 = arith.constant 1 : index
    %17 = memref.load %arg4[%c1_13] : memref<3xf32, #tpu.memory_space<smem>>
    %18 = vector.broadcast %17 : f32 to vector<64x64xf32>
    %19 = arith.mulf %16, %18 : vector<64x64xf32>
    %20 = arith.truncf %19 : vector<64x64xf32> to vector<64x64xbf16>
    %c0_14 = arith.constant 0 : index
    %c1_15 = arith.constant 1 : index
    %c0_16 = arith.constant 0 : index
    %c0_17 = arith.constant 0 : index
    %21 = vector.load %arg7[%c0_14, %c1_15, %c0_16, %c0_17] : memref<1x3x64x64xbf16, #tpu.memory_space<vmem>>, vector<1x1x64x64xbf16>
    %22 = vector.shape_cast %21 : vector<1x1x64x64xbf16> to vector<64x64xbf16>
    %23 = vector.shape_cast %20 : vector<64x64xbf16> to vector<1x1x64x64xbf16>
    tpu.vector_store %arg7[%c0_14, %c1_15, %c0_16, %c0_17], %23 {strides = array<i32>} : memref<1x3x64x64xbf16, #tpu.memory_space<vmem>>, vector<1x1x64x64xbf16>,
    %24 = arith.addf %7, %19 : vector<64x64xf32>
    %c0_18 = arith.constant 0 : index
    %c2 = arith.constant 2 : index
    %c0_19 = arith.constant 0 : index
    %c0_20 = arith.constant 0 : index
    %25 = vector.load %arg2[%c0_18, %c2, %c0_19, %c0_20] : memref<1x3x64x64xf32, #tpu.memory_space<vmem>>, vector<1x1x64x64xf32>
    %26 = vector.shape_cast %25 : vector<1x1x64x64xf32> to vector<64x64xf32>
    %c2_21 = arith.constant 2 : index
    %27 = memref.load %arg3[%c2_21] : memref<3xf32, #tpu.memory_space<smem>>
    %28 = vector.broadcast %27 : f32 to vector<64x64xf32>
    %29 = arith.subf %26, %28 : vector<64x64xf32>
    %c2_22 = arith.constant 2 : index
    %30 = memref.load %arg4[%c2_22] : memref<3xf32, #tpu.memory_space<smem>>
    %31 = vector.broadcast %30 : f32 to vector<64x64xf32>
    %32 = arith.mulf %29, %31 : vector<64x64xf32>
    %33 = arith.truncf %32 : vector<64x64xf32> to vector<64x64xbf16>
    %c0_23 = arith.constant 0 : index
    %c2_24 = arith.constant 2 : index
    %c0_25 = arith.constant 0 : index
    %c0_26 = arith.constant 0 : index
    %34 = vector.load %arg7[%c0_23, %c2_24, %c0_25, %c0_26] : memref<1x3x64x64xbf16, #tpu.memory_space<vmem>>, vector<1x1x64x64xbf16>
    %35 = vector.shape_cast %34 : vector<1x1x64x64xbf16> to vector<64x64xbf16>
    %36 = vector.shape_cast %33 : vector<64x64xbf16> to vector<1x1x64x64xbf16>
    tpu.vector_store %arg7[%c0_23, %c2_24, %c0_25, %c0_26], %36 {strides = array<i32>} : memref<1x3x64x64xbf16, #tpu.memory_space<vmem>>, vector<1x1x64x64xbf16>,
    %37 = arith.addf %24, %32 : vector<64x64xf32>
    %c0_27 = arith.constant 0 : index
    %c0_28 = arith.constant 0 : index
    %38 = vector.load %arg5[%c0_27, %c0_28] : memref<16x64xf32, #tpu.memory_space<vmem>>, vector<16x64xf32>
    %cst = arith.constant dense<0.000000e+00> : vector<16x64xf32>
    %39 = tpu.matmul %38, %37, %cst {dimension_numbers = #tpu.dot_dimension_numbers<[1], [0], [0], [1], [0, 0, 1, 1], [], []>} : vector<16x64xf32>, vector<64x64xf32>, vector<16x64xf32> -> vector<16x64xf32>
    %c0_29 = arith.constant 0 : index
    %c0_30 = arith.constant 0 : index
    %40 = vector.load %arg6[%c0_29, %c0_30] : memref<64x16xf32, #tpu.memory_space<vmem>>, vector<64x16xf32>
    %cst_31 = arith.constant dense<0.000000e+00> : vector<16x16xf32>
    %41 = tpu.matmul %39, %40, %cst_31 {dimension_numbers = #tpu.dot_dimension_numbers<[1], [0], [0], [1], [0, 0, 1, 1], [], []>} : vector<16x64xf32>, vector<64x16xf32>, vector<16x16xf32> -> vector<16x16xf32>
    %cst_32 = arith.constant 0.0416666679 : f32
    %42 = vector.broadcast %cst_32 : f32 to vector<16x16xf32>
    %43 = arith.mulf %41, %42 : vector<16x16xf32>
    %c0_33 = arith.constant 0 : index
    %c0_34 = arith.constant 0 : index
    %c0_35 = arith.constant 0 : index
    %44 = vector.load %arg8[%c0_33, %c0_34, %c0_35] : memref<1x16x16xf32, #tpu.memory_space<vmem>>, vector<1x16x16xf32>
    %45 = vector.shape_cast %44 : vector<1x16x16xf32> to vector<16x16xf32>
    %46 = vector.shape_cast %43 : vector<16x16xf32> to vector<1x16x16xf32>
    tpu.vector_store %arg8[%c0_33, %c0_34, %c0_35], %46 {strides = array<i32>} : memref<1x16x16xf32, #tpu.memory_space<vmem>>, vector<1x16x16xf32>,
    return
  }
  func.func @transform_0(%arg0: i32, %arg1: i32) -> (i32, i32, i32, i32) {
    %c0_i32 = arith.constant 0 : i32
    %c0_i32_0 = arith.constant 0 : i32
    %c0_i32_1 = arith.constant 0 : i32
    return %arg0, %c0_i32, %arg1, %c0_i32_0 : i32, i32, i32, i32
  }
  func.func @transform_1(%arg0: i32, %arg1: i32) -> i32 {
    %c0_i32 = arith.constant 0 : i32
    %c0_i32_0 = arith.constant 0 : i32
    return %c0_i32 : i32
  }
  func.func @transform_2(%arg0: i32, %arg1: i32) -> i32 {
    %c0_i32 = arith.constant 0 : i32
    %c0_i32_0 = arith.constant 0 : i32
    return %c0_i32 : i32
  }
  func.func @transform_3(%arg0: i32, %arg1: i32) -> (i32, i32) {
    %c0_i32 = arith.constant 0 : i32
    %c0_i32_0 = arith.constant 0 : i32
    %c0_i32_1 = arith.constant 0 : i32
    return %c0_i32, %c0_i32_0 : i32, i32
  }
  func.func @transform_4(%arg0: i32, %arg1: i32) -> (i32, i32) {
    %c0_i32 = arith.constant 0 : i32
    %c0_i32_0 = arith.constant 0 : i32
    %c0_i32_1 = arith.constant 0 : i32
    return %c0_i32, %c0_i32_0 : i32, i32
  }
  func.func @transform_5(%arg0: i32, %arg1: i32) -> (i32, i32, i32, i32) {
    %c0_i32 = arith.constant 0 : i32
    %c0_i32_0 = arith.constant 0 : i32
    %c0_i32_1 = arith.constant 0 : i32
    return %arg0, %c0_i32, %arg1, %c0_i32_0 : i32, i32, i32, i32
  }
  func.func @transform_6(%arg0: i32, %arg1: i32) -> (i32, i32, i32) {
    %c0_i32 = arith.constant 0 : i32
    %c0_i32_0 = arith.constant 0 : i32
    return %arg0, %arg1, %c0_i32 : i32, i32, i32
  }
}

</mosaic_0001>

<bundles_post_ra>
// kernel: tpu_custom_call.1
= control target key start
LH: loop header
LB: loop body
LE: loop exit
PB: predicated region body
PF: predicated region fallthrough
CT: control target
= control target key end

     0   :  { %s1514_s0 = inlined_call_operand.hbm [shape: f32[2,3,64,64], index: 0, kind: input, shape index: {}]   ;;  %s1515_s1 = inlined_call_operand.vmem [shape: f32[3], index: 1, kind: input, shape index: {}]   ;;  %s1516_s2 = inlined_call_operand.vmem [shape: f32[3], index: 2, kind: input, shape index: {}]   ;;  %s1517_s3 = inlined_call_operand.vmem [shape: f32[16,64], index: 3, kind: input, shape index: {}]   ;;  %s1518_s4 = inlined_call_operand.vmem [shape: f32[64,16], index: 4, kind: input, shape index: {}]   ;;  %s1519_s5 = inlined_call_operand.hbm [shape: bf16[2,3,64,64], index: 5, kind: output, shape index: {0}]   ;;  %s1520_s6 = inlined_call_operand.hbm [shape: f32[2,16,16], index: 6, kind: output, shape index: {1}]  }
   0x1   :  { %1524 = sst [smem:[#allocation19_spill]] %s1515_s1 }
   0x2   :  { %1525 = sst [smem:[#allocation20_spill]] %s1516_s2 }
   0x3   :  { %12 = vsyncpa [#allocation3], 0 }
   0x4   :  { %14 = vsyncpa [#allocation3 + $0x1], 0 }
   0x5   :  { %15 = vsyncpa [#allocation5], 0 }
   0x6   :  { %16 = vsyncpa [#allocation8], 0 }
   0x7   :  { %17 = vsyncpa [#allocation4], 0 }
   0x8   :  { %19 = vsyncpa [#allocation4 + $0x1], 0 }
   0x9   :  { %20 = vsyncpa [#allocation11], 0 }
   0xa   :  { %22 = vsyncpa [#allocation11 + $0x1], 0  ;;  %s1147_s21 = smov 0   ;;  %s1149_s22 = smov 0  }
   0xb   :  { %s1151_s23 = smov 0   ;;  %s1153_s24 = smov 0  }
   0xc   :  { %s1155_s25 = smov 0   ;;  %s1157_s26 = smov 0  }
   0xd LB: > { %1526 = sst [smem:[#allocation17_spill]] %s1102_s26  ;;  %s747_s27 = sadd.s32 4294967295, %s1102_s26   ;;  %s1102_s26 = sphi %s1157_s26, %s28_s26   ;;  %s1098_s25 = sphi %s1155_s25, %s1544_s25   ;;  %s1094_s24 = sphi %s1153_s24, %s1543_s24   ;;  %s1090_s23 = sphi %s1151_s23, %s1542_s23   ;;  %s1086_s22 = sphi %s1149_s22, %s1541_s22   ;;  %s1082_s21 = sphi %s1147_s21, %s1540_s21  }
   0xe   : > { %s748_s28 = sadd.s32 4294967294, %s1102_s26   ;;  %p56_p0 = scmp.ne.s32.totalorder %s1090_s23, %s1086_s22 }
   0xf   : > { %p57_p1 = scmp.eq.s32.totalorder %s1102_s26, 0  ;;  %p62_p2 = scmp.ne.s32.totalorder %s1086_s22, %s1082_s21 }
  0x10   : > { %p1185_p3 = scmp.eq.s32.totalorder %s747_s27, 0  ;;  %p172_p4 = scmp.eq.s32.totalorder %s747_s27, 1 }
  0x11   : > { %p1189_p5 = por %p57_p1, %p56_p0  ;;  %p178_p6 = scmp.eq.s32.totalorder %s748_s28, 1 }
  0x12   : > { %p1195_p7 = por %p1185_p3, %p62_p2  ;;  %p1199_p8 = por %p172_p4, %p56_p0 }
  0x13   : > { %p1203_p9 = por %p178_p6, %p62_p2  ;;  %p749_p10 = scmp.ge.s32.totalorder %s1102_s26, 1 }
  0x14   : > { %p213_p11 = scmp.lt.s32.totalorder %s1102_s26, 3  ;;  %s1533_s1 = sld [smem:[#allocation19_spill]] }
  0x15   : > { %s1531_s10 = scalar_select %p1203_p9, 1, 0 }
  0x16   : > { %p1212_p12 = pnand %p749_p10, %p213_p11  ;;  %p752_p13 = scmp.ge.s32.totalorder %s1102_s26, 2 }
  0x17   : > { %1532 = sst [smem:[#allocation18_spill]] %s1531_s10  ;;  %p860_p0 = scmp.lt.s32.totalorder %s1102_s26, 2 }
  0x18   : > { %p840_p1 = pneg %p1212_p12  ;;  %s1535_s2 = sld [smem:[#allocation20_spill]] }
  0x19   : > { %p1225_p2 = pnand %p860_p0, %p1189_p5  ;;  %s1104_s19 = smov [#allocation6]  }
  0x1a   : > { %s225_s13 = sshll.u32 %s1533_s1, 4  ;;  %p841_p4 = pnand %p840_p1, %p1185_p3  ;;  %s226_s13 = int_to_ptr.vmem [resolvable:$true] %s225_s13 }
  0x1b   : > { %s1105_s20 = smov [#allocation7]   ;;  %s40_s27 = sadd.s32 1, %s1098_s25 }
  0x1c   : > { %843 = dma.vmem_to_smem (!%p841_p4), %s226_s13, 16, %s1104_s19, [#allocation5]  }
  0x1d   : > { %s252_s28 = sand.u32 1, %s1090_s23   ;;  %p42_p6 = scmp.ge.s32.totalorder %s40_s27, 2 }
  0x1e   : > { %s235_s17 = sshll.u32 %s1535_s2, 4  ;;  %s821_s11 = smul.u32 192, %s252_s28  ;;  %s236_s17 = int_to_ptr.vmem [resolvable:$true] %s235_s17 }
  0x1f   : > { %846 = dma.vmem_to_smem (!%p841_p4), %s236_s17, 16, %s1105_s20, [#allocation8]  }
  0x20   : > { %s1546_s27 = smov (%p42_p6, %s40_s27), 0  ;;  %s822_s7 = smul.u32 192, %s1098_s25 }
  0x21   : > { %s44_s12 = ssub.s32 %s1098_s25, %s1546_s27  ;;  %s256_s15 = scalar_lea.vmem [#allocation2], %s821_s11 }
  0x22   : > { %s266_s16 = sshll.u32 %s256_s15, 4  ;;  %p47_p5 = scmp.eq.s32.totalorder %s44_s12, 0  ;;  %s267_s16 = int_to_ptr.vmem [resolvable:$true] %s266_s16 }
  0x23   : > { %s263_s13 = scalar_lea.hbm %s1514_s0, %s822_s7  ;;  %s1537_s17 = sadd.s32 1, %s1090_s23 }
  0x24   : > { %s264_s19 = sshll.u32 %s263_s13, 4  ;;  %s253_s2 = scalar_lea.sflag [#allocation3], %s252_s28  ;;  %s265_s19 = int_to_ptr.hbm [resolvable:$true] %s264_s19 }
  0x25   : > { %s1244_s20 = scalar_select %p47_p5, %s1090_s23, %s1537_s17  }
  0x26   : > { %s1106_s26 = smov 128   ;;  %s1107_s10 = smov 8  }
  0x27   : > { %850 = dma.hbm_to_vmem [thread:$0]  (!%p1225_p2), %s265_s19, 3072, %s267_s16, %s253_s2, %s1106_s26, %s1106_s26, %s1107_s10  }
  0x28   : > { %278 = sbr.rel (%p1212_p12) target bundleno = 359 (0x167), region = 40  ;;  %s1251_s11 = sand.u32 (!%p1212_p12), 1, %s1086_s22  }
  0x29   : > { %s823_s1 = smul.u32 (!%p1212_p12), 192, %s1251_s11  ;;  %s281_s29 = scalar_lea.sflag (!%p1212_p12), [#allocation3], %s1251_s11 }
  0x2b   : > { %s1255_s7 = scalar_lea.vmem (!%p1212_p12), [#allocation2], %s823_s1 }
  0x2d   : > { %1061 = dma.done.wait (%p1195_p7), %s281_s29, 3072  }
  0x2e   : > { %1063 = vsyncadd (%p1195_p7), %s281_s29, 4294964224 }
  0x2f   : > { %1065 = dma.done.wait (%p1185_p3), [#allocation5], 16  }
  0x30   : > { %1067 = vsyncadd (%p1185_p3), [#allocation5], 4294967280 }
  0x31   : > { %1069 = dma.done.wait (%p1185_p3), [#allocation8], 16  }
  0x32   : > { %1071 = vsyncadd (%p1185_p3), [#allocation8], 4294967280 }
  0x33   : > { %300 = sfence }
  0x34   : > { %s341_s2 = sld [smem:[#allocation6]]  ;;  %v340_v0 = vld [vmem:[%s1255_s7 + $0x38] sm:$0xff]  ;;  %v339_v1 = vld [vmem:[%s1255_s7 + $0x30] sm:$0xff]  ;;  %v338_v2 = vld [vmem:[%s1255_s7 + $0x28] sm:$0xff]  ;;  %s824_s18 = smul.u32 96, %s1251_s11  ;;  %vm369_vm0 = vcmask 519168  }
  0x35   : > { %s351_s26 = sld [smem:[#allocation7]]  ;;  %v1275_v3 = vld [vmem:[%s1255_s7 + $0x20] sm:$0xff]  ;;  %v1278_v4 = vld [vmem:[%s1255_s7 + $0x18] sm:$0xff]  ;;  %v1281_v5 = vld [vmem:[%s1255_s7 + $0x10] sm:$0xff]  ;;  %vm488_vm1 = vcmask 523264   ;;  %s825_s19 = smul.u32 96, %s1094_s24 }
  0x36   : > { %s766_s8 = sld [smem:[#allocation6 + $0x1]]  ;;  %v765_v7 = vld [vmem:[%s1255_s7 + $0x78] sm:$0xff]  ;;  %v764_v11 = vld [vmem:[%s1255_s7 + $0x70] sm:$0xff]  ;;  %v763_v13 = vld [vmem:[%s1255_s7 + $0x68] sm:$0xff]  ;;  %s1333_s13 = scalar_lea.vmem [#allocation9], %s824_s18 }
  0x37   : > { %s767_s10 = sld [smem:[#allocation7 + $0x1]]  ;;  %v783_v15 = vld [vmem:[%s1255_s7 + $0xb8] sm:$0xff]  ;;  %v782_v23 = vld [vmem:[%s1255_s7 + $0xb0] sm:$0xff]  ;;  %v781_v34 = vld [vmem:[%s1255_s7 + $0xa8] sm:$0xff]  ;;  %s579_s29 = scalar_lea.hbm %s1519_s5, %s825_s19 }
  0x38   : > { %s784_s14 = sld [smem:[#allocation6 + $0x2]]  ;;  %v525_v24 = vld [vmem:[%s1518_s4 + $0x38] sm:$0xff]  ;;  %v1315_v25 = vld [vmem:[%s1518_s4 + $0x30] sm:$0xff]  ;;  %v762_v47 = vld [vmem:[%s1255_s7 + $0x60] sm:$0xff]  ;;  %s1000_s18 = scalar_lea.hbm %s1519_s5, 192 }
  0x39   : > { %s1272_s30 = sld [smem:[#allocation7 + $0x2]]  ;;  %813 = vmatpush.msra.mxu3 %v525_v24  ;;  %540 = vmatpush.msra.mxu1 %v525_v24  ;;  %v780_v48 = vld [vmem:[%s1255_s7 + $0xa0] sm:$0xff]  ;;  %v761_v53 = vld [vmem:[%s1255_s7 + $0x58] sm:$0xff]  ;;  %v760_v62 = vld [vmem:[%s1255_s7 + $0x50] sm:$0xff] }
  0x3a   : > { %v1284_v6 = vstv %s341_s2  ;;  %v779_v61 = vld [vmem:[%s1255_s7 + $0x98] sm:$0xff]  ;;  %s582_s2 = sshll.u32 %s579_s29, 4  ;;  %s583_s2 = int_to_ptr.hbm [resolvable:$true] %s582_s2 }
  0x3b   : > { %v350_v8 = vsub.f32 %v340_v0, %v1284_v6  ;;  %v1288_v9 = vstv %s351_s26  ;;  %v349_v10 = vsub.f32 %v339_v1, %v1284_v6  ;;  %v348_v12 = vsub.f32 %v338_v2, %v1284_v6  ;;  %814 = vmatpush.msra.mxu3 %v1315_v25  ;;  %541 = vmatpush.msra.mxu1 %v1315_v25  ;;  %v487_v25 = vld [vmem:[%s1517_s3 + $0x8] sm:$0xff]  ;;  %s561_s26 = scalar_lea.sflag [#allocation4], %s1251_s11 }
  0x3c   : > { %v1294_v14 = vstv %s766_s8  ;;  %v347_v16 = vsub.f32 %v1275_v3, %v1284_v6  ;;  %v346_v17 = vsub.f32 %v1278_v4, %v1284_v6  ;;  %v345_v18 = vsub.f32 %v1281_v5, %v1284_v6  ;;  %s994_s8 = sshra.s32 %s583_s2, 4  ;;  %s995_s8 = int_to_ptr.hbm [resolvable:$true] %s994_s8 }
  0x3d   : > { %v360_v19 = vmul.f32 %v1288_v9, %v350_v8  ;;  %v396_v20 = vsub.f32 %v765_v7, %v1294_v14  ;;  %v1305_v21 = vstv %s767_s10  ;;  %v359_v22 = vmul.f32 %v1288_v9, %v349_v10  ;;  %s996_s10 = scalar_lea.hbm %s995_s8, 96  ;;  %p1001_p11 = scmp.lt.s32.totalorder %s995_s8, %s1519_s5 }
  0x3e   : > { %v1317_v26 = vstv %s784_s14  ;;  %v395_v27 = vsub.f32 %v764_v11, %v1294_v14  ;;  %v358_v28 = vmul.f32 %v1288_v9, %v348_v12  ;;  %v394_v29 = vsub.f32 %v763_v13, %v1294_v14  ;;  %v778_v13 = vld [vmem:[%s1255_s7 + $0x90] sm:$0xff]  ;;  %p997_p3 = scmp.ne.s32.totalorder %s995_s8, %s996_s10  ;;  %p1002_p12 = scmp.lt.s32.totalorder %s1000_s18, %s996_s10 }
  0x3f   : > { %v368_v30 = vpack.c.bf16 %v360_v19, %v360_v19  ;;  %v406_v31 = vmul.f32 %v1305_v21, %v396_v20  ;;  %v450_v32 = vsub.f32 %v783_v15, %v1317_v26  ;;  %v1325_v33 = vstv %s1272_s30  ;;  %v334_v15 = vld [vmem:[%s1255_s7 + $0x8] sm:$0xff] }
  0x40   : > { %v367_v35 = vpack.c.bf16 %v359_v22, %v359_v22  ;;  %v405_v36 = vmul.f32 %v1305_v21, %v395_v27  ;;  %v449_v37 = vsub.f32 %v782_v23, %v1317_v26  ;;  %v366_v38 = vpack.c.bf16 %v358_v28, %v358_v28  ;;  %v759_v20 = vld [vmem:[%s1255_s7 + $0x48] sm:$0xff]  ;;  %p998_p7 = pnand %p997_p3, %p1199_p8  ;;  %p1003_p0 = por %p1002_p12, %p1001_p11 }
  0x41   : > { %377 = vst.msk [vmem:[%s1333_s13 + $0x1c] sm:$0xf] %vm369_vm0, %v368_v30  ;;  %v414_v39 = vpack.c.bf16 %v406_v31, %v406_v31  ;;  %v431_v40 = vadd.f32 %v406_v31, %v360_v19  ;;  %v460_v41 = vmul.f32 %v1325_v33, %v450_v32  ;;  %v404_v42 = vmul.f32 %v1305_v21, %v394_v29  ;;  %v333_v31 = vld [vmem:[%s1255_s7] sm:$0xff] }
  0x42   : > { %376 = vst.msk [vmem:[%s1333_s13 + $0x18] sm:$0xf] %vm369_vm0, %v367_v35  ;;  %v413_v43 = vpack.c.bf16 %v405_v36, %v405_v36  ;;  %v430_v44 = vadd.f32 %v405_v36, %v359_v22  ;;  %v459_v45 = vmul.f32 %v1325_v33, %v449_v37  ;;  %v448_v46 = vsub.f32 %v781_v34, %v1317_v26  ;;  %v777_v22 = vld [vmem:[%s1255_s7 + $0x88] sm:$0xff]  ;;  %v758_v37 = vld [vmem:[%s1255_s7 + $0x40] sm:$0xff]  ;;  %p999_p10 = pneg %p998_p7 }
  0x43   : > { %775 = vst.msk [vmem:[%s1333_s13 + $0x3c] sm:$0xf] %vm369_vm0, %v414_v39  ;;  %v468_v49 = vpack.c.bf16 %v460_v41, %v460_v41  ;;  %v485_v50 = vadd.f32 %v460_v41, %v431_v40  ;;  %v412_v51 = vpack.c.bf16 %v404_v42, %v404_v42  ;;  %v429_v52 = vadd.f32 %v404_v42, %v358_v28 }
  0x44   : > { %774 = vst.msk [vmem:[%s1333_s13 + $0x38] sm:$0xf] %vm369_vm0, %v413_v43  ;;  %v467_v54 = vpack.c.bf16 %v459_v45, %v459_v45  ;;  %v484_v55 = vadd.f32 %v459_v45, %v430_v44  ;;  %v458_v56 = vmul.f32 %v1325_v33, %v448_v46  ;;  %v357_v57 = vmul.f32 %v1288_v9, %v347_v16  ;;  %v776_v45 = vld [vmem:[%s1255_s7 + $0x80] sm:$0xff]  ;;  %s580_s7 = sshll.u32 %s1333_s13, 4  ;;  %p1004_p1 = pnand %p1003_p0, %p999_p10  ;;  %s581_s7 = int_to_ptr.vmem [resolvable:$true] %s580_s7 }
  0x45   : > { %793 = vst.msk [vmem:[%s1333_s13 + $0x5c] sm:$0xf] %vm369_vm0, %v468_v49  ;;  %805 = vmatpush.msra.mxu2 %v485_v50  ;;  %v393_v58 = vsub.f32 %v762_v47, %v1294_v14  ;;  %v447_v59 = vsub.f32 %v780_v48, %v1317_v26  ;;  %v356_v60 = vmul.f32 %v1288_v9, %v346_v17  ;;  %v523_v49 = vld [vmem:[%s1518_s4 + $0x28] sm:$0xff] }
  0x46   : > { %503 = vmatpush.msra.mxu0 %v485_v50  ;;  %792 = vst.msk [vmem:[%s1333_s13 + $0x58] sm:$0xf] %vm369_vm0, %v467_v54  ;;  %v466_v63 = vpack.c.bf16 %v458_v56, %v458_v56  ;;  %v483_v0 = vadd.f32 %v458_v56, %v429_v52  ;;  %v365_v1 = vpack.c.bf16 %v357_v57, %v357_v57  ;;  %v522_v56 = vld [vmem:[%s1518_s4 + $0x20] sm:$0xff] }
  0x47   : > { %v392_v2 = vsub.f32 %v761_v53, %v1294_v14  ;;  %806 = vmatpush.msra.mxu2 %v484_v55  ;;  %375 = vst.msk [vmem:[%s1333_s13 + $0x14] sm:$0xf] %vm369_vm0, %v366_v38  ;;  %v403_v3 = vmul.f32 %v1305_v21, %v393_v58  ;;  %v457_v4 = vmul.f32 %v1325_v33, %v447_v59 }
  0x48   : > { %v364_v7 = vpack.c.bf16 %v356_v60, %v356_v60  ;;  %504 = vmatpush.msra.mxu0 %v484_v55  ;;  %773 = vst.msk [vmem:[%s1333_s13 + $0x34] sm:$0xf] %vm369_vm0, %v412_v51  ;;  %v446_v10 = vsub.f32 %v779_v61, %v1317_v26  ;;  %v355_v11 = vmul.f32 %v1288_v9, %v345_v18  ;;  %v520_v61 = vld [vmem:[%s1518_s4 + $0x10] sm:$0xff] }
  0x49   : > { %v402_v8 = vmul.f32 %v1305_v21, %v392_v2  ;;  %v391_v12 = vsub.f32 %v760_v62, %v1294_v14  ;;  %791 = vst.msk [vmem:[%s1333_s13 + $0x54] sm:$0xf] %vm369_vm0, %v466_v63  ;;  %807 = vmatpush.msra.mxu2 %v483_v0  ;;  %v411_v16 = vpack.c.bf16 %v403_v3, %v403_v3  ;;  %v519_v62 = vld [vmem:[%s1518_s4 + $0x8] sm:$0xff]  ;;  %v518_v63 = vld [vmem:[%s1518_s4] sm:$0xff] }
  0x4a   : > { %v428_v17 = vadd.f32 %v403_v3, %v357_v57  ;;  %v465_v19 = vpack.c.bf16 %v457_v4, %v457_v4  ;;  %505 = vmatpush.msra.mxu0 %v483_v0  ;;  %374 = vst.msk [vmem:[%s1333_s13 + $0x10] sm:$0xf] %vm369_vm0, %v365_v1  ;;  %v456_v23 = vmul.f32 %v1325_v33, %v446_v10 }
  0x4b   : > { %v410_v5 = vpack.c.bf16 %v402_v8, %v402_v8  ;;  %v427_v18 = vadd.f32 %v402_v8, %v356_v60  ;;  %v363_v24 = vpack.c.bf16 %v355_v11, %v355_v11  ;;  %772 = vst.msk [vmem:[%s1333_s13 + $0x30] sm:$0xf] %vm369_vm0, %v411_v16  ;;  %v401_v28 = vmul.f32 %v1305_v21, %v391_v12  ;;  %v486_v60 = vld [vmem:[%s1517_s3] sm:$0xff] }
  0x4c   : > { %v482_v27 = vadd.f32 %v457_v4, %v428_v17  ;;  %v445_v29 = vsub.f32 %v778_v13, %v1317_v26  ;;  %v344_v30 = vsub.f32 %v334_v15, %v1284_v6  ;;  %790 = vst.msk [vmem:[%s1333_s13 + $0x50] sm:$0xf] %vm369_vm0, %v465_v19  ;;  %v464_v32 = vpack.c.bf16 %v456_v23, %v456_v23 }
  0x4d   : > { %v481_v34 = vadd.f32 %v456_v23, %v427_v18  ;;  %v390_v35 = vsub.f32 %v759_v20, %v1294_v14  ;;  %v444_v36 = vsub.f32 %v777_v22, %v1317_v26  ;;  %373 = vst.msk [vmem:[%s1333_s13 + $0xc] sm:$0xf] %vm369_vm0, %v364_v7  ;;  %v409_v38 = vpack.c.bf16 %v401_v28, %v401_v28 }
  0x4e   : > { %808 = vmatpush.msra.mxu2 %v482_v27  ;;  %v426_v39 = vadd.f32 %v401_v28, %v355_v11  ;;  %v455_v40 = vmul.f32 %v1325_v33, %v445_v29  ;;  %506 = vmatpush.msra.mxu0 %v482_v27  ;;  %771 = vst.msk [vmem:[%s1333_s13 + $0x2c] sm:$0xf] %vm369_vm0, %v410_v5 }
  0x4f   : > { %v354_v41 = vmul.f32 %v1288_v9, %v344_v30  ;;  %v400_v42 = vmul.f32 %v1305_v21, %v390_v35  ;;  %v454_v43 = vmul.f32 %v1325_v33, %v444_v36  ;;  %v343_v44 = vsub.f32 %v333_v31, %v1284_v6  ;;  %789 = vst.msk [vmem:[%s1333_s13 + $0x4c] sm:$0xf] %vm369_vm0, %v464_v32 }
  0x50   : > { %809 = vmatpush.msra.mxu2 %v481_v34  ;;  %v463_v46 = vpack.c.bf16 %v455_v40, %v455_v40  ;;  %v480_v47 = vadd.f32 %v455_v40, %v426_v39  ;;  %v389_v48 = vsub.f32 %v758_v37, %v1294_v14  ;;  %507 = vmatpush.msra.mxu0 %v481_v34 }
  0x51   : > { %372 = vst.msk [vmem:[%s1333_s13 + $0x8] sm:$0xf] %vm369_vm0, %v363_v24  ;;  %v362_v50 = vpack.c.bf16 %v354_v41, %v354_v41  ;;  %v408_v51 = vpack.c.bf16 %v400_v42, %v400_v42  ;;  %v425_v6 = vadd.f32 %v400_v42, %v354_v41  ;;  %v462_v52 = vpack.c.bf16 %v454_v43, %v454_v43 }
  0x52   : > { %770 = vst.msk [vmem:[%s1333_s13 + $0x28] sm:$0xf] %vm369_vm0, %v409_v38  ;;  %810 = vmatpush.msra.mxu2 %v480_v47  ;;  %v353_v53 = vmul.f32 %v1288_v9, %v343_v44  ;;  %v399_v14 = vmul.f32 %v1305_v21, %v389_v48  ;;  %v443_v54 = vsub.f32 %v776_v45, %v1317_v26 }
  0x53   : > { %508 = vmatpush.msra.mxu0 %v480_v47  ;;  %788 = vst.msk [vmem:[%s1333_s13 + $0x48] sm:$0xf] %vm369_vm0, %v463_v46  ;;  %v479_v55 = vadd.f32 %v454_v43, %v425_v6  ;;  %815 = vmatpush.msra.mxu3 %v523_v49 }
  0x54   : > { %371 = vst.msk [vmem:[%s1333_s13 + $0x4] sm:$0xf] %vm369_vm0, %v362_v50  ;;  %v361_v9 = vpack.c.bf16 %v353_v53, %v353_v53  ;;  %v407_v57 = vpack.c.bf16 %v399_v14, %v399_v14  ;;  %v424_v21 = vadd.f32 %v399_v14, %v353_v53  ;;  %v453_v26 = vmul.f32 %v1325_v33, %v443_v54  ;;  %v521_v33 = vld [vmem:[%s1518_s4 + $0x18] sm:$0xff] }
  0x55   : > { %769 = vst.msk [vmem:[%s1333_s13 + $0x24] sm:$0xf] %vm369_vm0, %v408_v51  ;;  %811 = vmatpush.msra.mxu2 %v479_v55  ;;  %509 = vmatpush.msra.mxu0 %v479_v55 }
  0x56   : > { %787 = vst.msk [vmem:[%s1333_s13 + $0x44] sm:$0xf] %vm369_vm0, %v462_v52  ;;  %v461_v58 = vpack.c.bf16 %v453_v26, %v453_v26  ;;  %v478_v59 = vadd.f32 %v453_v26, %v424_v21  ;;  %816 = vmatpush.msra.mxu3 %v522_v56  ;;  %542 = vmatpush.msra.mxu1 %v523_v49 }
  0x57   : > { %370 = vst.msk [vmem:[%s1333_s13] sm:$0xf] %vm369_vm0, %v361_v9 }
  0x58   : > { %768 = vst.msk [vmem:[%s1333_s13 + $0x20] sm:$0xf] %vm369_vm0, %v407_v57  ;;  %812 = vmatpush.msra.mxu2 %v478_v59  ;;  %510 = vmatpush.msra.mxu0 %v478_v59 }
  0x59   : > { %786 = vst.msk [vmem:[%s1333_s13 + $0x40] sm:$0xf] %vm369_vm0, %v461_v58  ;;  %795 = vmatmul.msk.f32.vlgmr.msra.gmra.mxu2 %vm488_vm1, %v487_v25  ;;  %794 = vmatmul.msk.f32.vlgmr.msra.gmra.mxu0 %vm488_vm1, %v486_v60 }
  0x5a   : > { %817 = vmatpush.msra.mxu3 %v521_v33  ;;  %543 = vmatpush.msra.mxu1 %v522_v56 }
  0x5c   : > { %818 = vmatpush.msra.mxu3 %v520_v61  ;;  %544 = vmatpush.msra.mxu1 %v521_v33 }
  0x5e   : > { %819 = vmatpush.msra.mxu3 %v519_v62  ;;  %545 = vmatpush.msra.mxu1 %v520_v61 }
  0x60   : > { %546 = vmatpush.msra.mxu1 %v519_v62  ;;  %820 = vmatpush.msra.mxu3 %v518_v63 }
  0x62   : > { %547 = vmatpush.msra.mxu1 %v518_v63 }
  0xd6   : > { %v512_v0 = vpop.f32.mrf.mxu0 }
  0xd7   : > { %796 = vmatmul.msk.f32.vlgmr.msra.gmra.mxu1 %vm488_vm1, %v512_v0 }
  0xdc   : > { %v515_v1 = vpop.f32.mrf.mxu2 }
  0xdd   : > { %797 = vmatmul.msk.f32.vlgmr.msra.gmra.mxu3 %vm488_vm1, %v515_v1 }
  0xde   : > { %1007 = shalt.err (!%p1004_p1)
}
  0xdf   : > { %s1108_s13 = smov 64   ;;  %s1109_s15 = smov 4   ;;  %vm557_vm2 = vcmask 130048  }
  0xe0   : > { %836 = dma.vmem_to_hbm [thread:$0]  (%p1199_p8), %s581_s7, 1536, %s583_s2, %s561_s26, %s1108_s13, %s1108_s13, %s1109_s15  }
  0xe1   : > { %s757_s16 = sshll.u32 %s1251_s11, 4  ;;  %s804_s17 = sshll.u32 %s1094_s24, 4 }
  0xe2   : > { %s329_s19 = scalar_lea.vmem [#allocation10], %s757_s16  ;;  %s598_s8 = scalar_lea.hbm %s1520_s6, %s804_s17 }
  0xe3   : > { %s599_s10 = sshll.u32 %s329_s19, 4  ;;  %s601_s14 = sshll.u32 %s598_s8, 4  ;;  %s600_s10 = int_to_ptr.vmem [resolvable:$true] %s599_s10  ;;  %s602_s14 = int_to_ptr.hbm [resolvable:$true] %s601_s14 }
  0xe4   : > { %s566_s7 = scalar_lea.sflag [#allocation11], %s1251_s11  ;;  %s1022_s2 = sshra.s32 %s602_s14, 4  ;;  %s1023_s2 = int_to_ptr.hbm [resolvable:$true] %s1022_s2 }
  0xe5   : > { %s1024_s26 = scalar_lea.hbm %s1023_s2, 16  ;;  %s1028_s18 = scalar_lea.hbm %s1520_s6, 32 }
  0xe6   : > { %p1025_p2 = scmp.ne.s32.totalorder %s1023_s2, %s1024_s26  ;;  %p1029_p5 = scmp.lt.s32.totalorder %s1023_s2, %s1520_s6 }
  0xe7   : > { %p1030_p3 = scmp.lt.s32.totalorder %s1028_s18, %s1024_s26 }
  0xe8   : > { %p1026_p4 = pnand %p1025_p2, %p1199_p8 }
  0xe9   : > { %p1031_p7 = por %p1030_p3, %p1029_p5 }
  0xea   : > { %p1027_p6 = pneg %p1026_p4 }
  0xec   : > { %p1032_p10 = pnand %p1031_p7, %p1027_p6 }
 0x154   : > { %v549_v2 = vpop.f32.mrf.mxu1 }
 0x155   : > { %v555_v3 = vmul.f32 0.041666668, %v549_v2 }
 0x157   : > { %558 = vst.msk [vmem:[%s329_s19] sm:$0xff] %vm557_vm2, %v555_v3 }
 0x160   : > { %v552_v4 = vpop.f32.mrf.mxu3 }
 0x161   : > { %v556_v7 = vmul.f32 0.041666668, %v552_v4 }
 0x163   : > { %559 = vst.msk [vmem:[%s329_s19 + $0x8] sm:$0xff] %vm557_vm2, %v556_v7 }
 0x164   : > { %1035 = shalt.err (!%p1032_p10)
}
 0x165   : > { %s1110_s11 = smov 128   ;;  %s1111_s13 = smov 8  }
 0x166   : > { %837 = dma.vmem_to_hbm [thread:$0]  (%p1199_p8), %s600_s10, 256, %s602_s14, %s566_s7, %s1110_s11, %s1110_s11, %s1111_s13  }
 0x167 PF: > { %s1539_s16 = sld [smem:[#allocation17_spill]]  ;;  %s616_s19 = sand.u32 1, %s1082_s21  }
 0x168   : > { %p852_p11 = pnand %p752_p13, %p1203_p9  ;;  %s617_s17 = scalar_lea.sflag [#allocation4], %s616_s19 }
 0x16a   : > { %p853_p12 = pneg %p852_p11 }
 0x16c   : > { %1073 = dma.done.wait (%p853_p12), %s617_s17, 1536  }
 0x16d   : > { %1075 = vsyncadd (%p853_p12), %s617_s17, 4294965760  ;;  %s627_s1 = scalar_lea.sflag [#allocation11], %s616_s19 }
 0x16e   : > { %1077 = dma.done.wait (%p853_p12), %s627_s1, 256  }
 0x16f   : > { %1079 = vsyncadd (%p853_p12), %s627_s1, 4294967040  ;;  %s28_s26 = sadd.s32 1, %s1539_s16   ;;  %s1540_s21 = smov %s1086_s22 }
 0x170   : > { %p25_p0 = scmp.ge.s32.totalorder %s28_s26, 4   ;;  %s1541_s22 = smov %s1090_s23 }
 0x171   : > { %s1542_s23 = smov %s1244_s20  ;;  %s1543_s24 = smov %s1098_s25 }
 0x172   : > { %s1544_s25 = smov %s1546_s27  ;;  %27 = sbr.rel (!%p25_p0) target bundleno = 13 (0xd), region = 115 }
 0x177   :  { %633 = vsyncpa [#allocation3], 1 }
 0x178   :  { %635 = vsyncpa [#allocation3 + $0x1], 1 }
 0x179   :  { %636 = vsyncpa [#allocation4], 1 }
 0x17a   :  { %638 = vsyncpa [#allocation4 + $0x1], 1 }
 0x17b   :  { %639 = vsyncpa [#allocation11], 1 }
 0x17c   :  { %641 = vsyncpa [#allocation11 + $0x1], 1 }
 0x17d   :  { %642 = vsyncpa [#allocation5], 1 }
 0x17e   :  { %644 = vsyncpa [#allocation5 + $0x1], 1 }
 0x17f   :  { %645 = vsyncpa [#allocation8], 1 }

</bundles_post_ra>
